<compile_context>
chip_gen: v7x
topology: tpu7x:2x2x1
jax: 0.10.0
libtpu: 0.0.40
codegen_flags: <defaults>
</compile_context>

<pallas_src>
import functools

import jax
import jax.numpy as jnp
from jax.experimental import pallas as pl
from jax.experimental.pallas import tpu as pltpu

LANE = 128
SUBLANE = 8
MAX_BLOCK_ROWS = 8192          # (8192, 128) f32 tile = 4 MiB per input per buffer
CHUNK_ROWS = 1024              # inner reduction chunk (keeps temporaries small)
NEG_PAD = -1e9                 # sigmoid(NEG_PAD) == 0.0 exactly in f32
VMEM_LIMIT_BYTES = 48 * 1024 * 1024   # > default scoped VMEM, < v7x physical


def _num_tensorcores():
    """2 on multi-TensorCore chips (v7x); 1 on single-TC v5e/v6e."""
    try:
        kind = jax.devices()[0].device_kind.lower()
    except Exception:
        return 1
    return 2 if "v7" in kind else 1


def _dice_partial_kernel(x_ref, t_ref, acc_ref, *, nblocks, blocks_per_split,
                         block_rows, rows_in_last, has_overflow, chunk_rows):
    """Accumulate per-split partial sums of (p*t, p + t) into acc_ref.

    acc_ref block is (1, 2, 8, 128) f32 and stays resident across the inner
    ("arbitrary") grid axis, acting as the accumulator.
    """
    c = pl.program_id(0)   # split index (core-parallel on multi-TC chips)
    i = pl.program_id(1)   # row-block index within the split ("arbitrary")

    @pl.when(i == 0)
    def _init():
        acc_ref[...] = jnp.zeros_like(acc_ref)

    zeros = jnp.zeros((SUBLANE, LANE), jnp.float32)

    def chunk_sums(start, rows):
        # `start` / `rows` are static Python ints; rows is a multiple of 8.
        x = x_ref[pl.ds(start, rows), :].astype(jnp.float32)
        t = t_ref[pl.ds(start, rows), :].astype(jnp.float32)
        p = jax.nn.sigmoid(x)                                  # EUP
        # Tile-aligned regroup + leading-axis sum -> pure vreg-wise VPU adds
        # (no per-step cross-lane reduce).
        pt = jnp.sum((p * t).reshape(rows // SUBLANE, SUBLANE, LANE), axis=0)
        s = jnp.sum((p + t).reshape(rows // SUBLANE, SUBLANE, LANE), axis=0)
        return pt, s

    def accumulate(nrows):
        # nrows: static Python int (multiple of 8, <= block_rows).
        acc_pt, acc_s = zeros, zeros
        n_full = nrows // chunk_rows
        rem = nrows % chunk_rows
        for j in range(n_full):                 # short static loop (<= 8 iters)
            pt, s = chunk_sums(j * chunk_rows, chunk_rows)
            acc_pt, acc_s = acc_pt + pt, acc_s + s
        if rem:
            pt, s = chunk_sums(n_full * chunk_rows, rem)
            acc_pt, acc_s = acc_pt + pt, acc_s + s
        acc_ref[0, 0] += acc_pt                 # sum(sigmoid(x) * t)
        acc_ref[0, 1] += acc_s                  # sum(sigmoid(x)) + sum(t)

    blk = c * blocks_per_split + i              # conceptual (unclamped) block

    if rows_in_last == block_rows and not has_overflow:
        # Every grid step maps to a full, valid block: no guards at all.
        accumulate(block_rows)
    elif rows_in_last == block_rows:
        # Only clamped overflow steps (re-reads of the last block) to skip.
        @pl.when(blk < nblocks)
        def _():
            accumulate(block_rows)
    else:
        # Interior blocks are full; the last block has only `rows_in_last`
        # valid rows (the remainder is Pallas OOB garbage -> never read).
        @pl.when(blk < nblocks - 1)
        def _full():
            accumulate(block_rows)

        @pl.when(blk == nblocks - 1)
        def _tail():
            accumulate(rows_in_last)


@jax.jit
def dice_loss(inputs, targets, smooth=1e-5):
    """Pallas equivalent of DiceLoss.forward(inputs, targets, smooth)."""
    total = inputs.size
    x = inputs.reshape(-1)
    t = targets.reshape(-1)

    # View as a lane-dense (m, 128) slab with m % 8 == 0. The pad is a no-op
    # whenever total is already a multiple of 1024 (typical for NCHW tensors).
    # Pad values are chosen so padded elements contribute exactly zero
    # (sigmoid(NEG_PAD) == 0, targets pad == 0) -> no in-kernel masking.
    chunk = SUBLANE * LANE
    padded = ((total + chunk - 1) // chunk) * chunk
    if padded != total:
        x = jnp.pad(x, (0, padded - total), constant_values=NEG_PAD)
        t = jnp.pad(t, (0, padded - total), constant_values=0)
    m = padded // LANE
    x2d = x.reshape(m, LANE)
    t2d = t.reshape(m, LANE)

    block_rows = min(MAX_BLOCK_ROWS, m)              # multiple of 8 (or full m)
    nblocks = (m + block_rows - 1) // block_rows
    rows_in_last = m - (nblocks - 1) * block_rows    # static, multiple of 8

    num_tc = _num_tensorcores()
    num_splits = num_tc if nblocks >= num_tc else 1
    blocks_per_split = (nblocks + num_splits - 1) // num_splits
    has_overflow = num_splits * blocks_per_split > nblocks

    def in_map(c, i):
        # Clamp so (fully skipped) overflow steps re-read the last real block
        # instead of indexing past the array.
        return (jnp.minimum(c * blocks_per_split + i, nblocks - 1), 0)

    kernel = functools.partial(
        _dice_partial_kernel,
        nblocks=nblocks,
        blocks_per_split=blocks_per_split,
        block_rows=block_rows,
        rows_in_last=rows_in_last,
        has_overflow=has_overflow,
        chunk_rows=min(CHUNK_ROWS, block_rows),
    )

    if num_splits > 1:
        # Genuinely shard the leading axis across TensorCores (v7x).
        dims = (getattr(pltpu, "CORE_PARALLEL", pltpu.PARALLEL), pltpu.ARBITRARY)
    else:
        dims = (pltpu.ARBITRARY, pltpu.ARBITRARY)

    partials = pl.pallas_call(
        kernel,
        out_shape=jax.ShapeDtypeStruct((num_splits, 2, SUBLANE, LANE),
                                       jnp.float32),
        grid_spec=pltpu.PrefetchScalarGridSpec(
            num_scalar_prefetch=0,
            grid=(num_splits, blocks_per_split),
            in_specs=[
                pl.BlockSpec((block_rows, LANE), in_map),
                pl.BlockSpec((block_rows, LANE), in_map),
            ],
            out_specs=pl.BlockSpec((1, 2, SUBLANE, LANE),
                                   lambda c, i: (c, 0, 0, 0)),
        ),
        compiler_params=pltpu.CompilerParams(
            dimension_semantics=dims,
            vmem_limit_bytes=VMEM_LIMIT_BYTES,
        ),
    )(x2d, t2d)

    # Tiny epilogue: combine per-split vreg-shaped partials, then the scalar
    # dice + log-cosh formula (a handful of flops).
    inter = jnp.sum(partials[:, 0])
    denom = jnp.sum(partials[:, 1])
    dice = (2.0 * inter + smooth) / (denom + smooth)
    loss = 1.0 - dice
    return jnp.log((jnp.exp(loss) + jnp.exp(-loss)) / 2.0)


def dice_loss_ref(inputs, targets, smooth=1e-5):
    p = jax.nn.sigmoid(inputs.astype(jnp.float32)).reshape(-1)
    t = targets.astype(jnp.float32).reshape(-1)
    inter = jnp.sum(p * t)
    dice = (2.0 * inter + smooth) / (jnp.sum(p) + jnp.sum(t) + smooth)
    loss = 1.0 - dice
    return jnp.log((jnp.exp(loss) + jnp.exp(-loss)) / 2.0)


if __name__ == "__main__":
    key = jax.random.PRNGKey(0)
    k1, k2, k3, k4 = jax.random.split(key, 4)

    # Primary shape consistent with a segmentation logit/mask pair (NCHW).
    inputs = jax.random.normal(k1, (2, 4, 16, 16), dtype=jnp.float32)
    targets = (jax.random.uniform(k2, (2, 4, 16, 16)) > 0.5).astype(jnp.float32)
    out = jax.block_until_ready(dice_loss(inputs, targets))
    ref = jax.block_until_ready(dice_loss_ref(inputs, targets))
    assert jnp.allclose(out, ref, atol=1e-5, rtol=1e-4), (out, ref)

    # Ragged element count (exercises the constant-pad tail path).
    inputs2 = jax.random.normal(k3, (2, 3, 7, 11), dtype=jnp.float32)
    targets2 = (jax.random.uniform(k4, (2, 3, 7, 11)) > 0.5).astype(jnp.float32)
    out2 = jax.block_until_ready(dice_loss(inputs2, targets2))
    ref2 = jax.block_until_ready(dice_loss_ref(inputs2, targets2))
    assert jnp.allclose(out2, ref2, atol=1e-5, rtol=1e-4), (out2, ref2)

    # Multi-block streaming with a partial last block; bf16 inputs exercise
    # the native-dtype (reduced HBM traffic) path.
    inputs3 = jax.random.normal(k1, (2, 3, 640, 640), dtype=jnp.bfloat16)
    targets3 = (jax.random.uniform(k2, (2, 3, 640, 640)) > 0.5).astype(jnp.bfloat16)
    out3 = jax.block_until_ready(dice_loss(inputs3, targets3))
    ref3 = jax.block_until_ready(dice_loss_ref(inputs3, targets3))
    assert jnp.allclose(out3, ref3, atol=1e-4, rtol=1e-3), (out3, ref3)

    print("KERNEL_OK")
</pallas_src>

<mosaic_0001>
module attributes {stable_mosaic.version = 11 : i64} {
  func.func @_dice_partial_kernel(%arg0: i32, %arg1: i32, %arg2: memref<16x128xf32, #tpu.memory_space<vmem>>, %arg3: memref<16x128xf32, #tpu.memory_space<vmem>>, %arg4: memref<1x2x8x128xf32, #tpu.memory_space<vmem>>) attributes {dimension_semantics = [#tpu.dimension_semantics<arbitrary>, #tpu.dimension_semantics<arbitrary>], iteration_bounds = array<i64: 1, 1>, scalar_prefetch = 0 : i64, scratch_operands = 0 : i64, tpu.core_type = #tpu.core_type<tc>, window_params = [{transform_indices = @transform_0, window_bounds = array<i64: 16, 128>}, {transform_indices = @transform_1, window_bounds = array<i64: 16, 128>}, {transform_indices = @transform_2, window_bounds = array<i64: 1, 2, 8, 128>}]} {
    %c0_i32 = arith.constant 0 : i32
    %0 = arith.cmpi eq, %arg1, %c0_i32 : i32
    %1 = arith.extui %0 : i1 to i32
    %c0_i32_0 = arith.constant 0 : i32
    %2 = arith.cmpi ne, %1, %c0_i32_0 : i32
    scf.if %2 {
      %cst_22 = arith.constant 0.000000e+00 : f32
      %31 = vector.broadcast %cst_22 : f32 to vector<1x2x8x128xf32>
      %c0_23 = arith.constant 0 : index
      %c0_24 = arith.constant 0 : index
      %c0_25 = arith.constant 0 : index
      %c0_26 = arith.constant 0 : index
      %32 = vector.load %arg4[%c0_23, %c0_24, %c0_25, %c0_26] : memref<1x2x8x128xf32, #tpu.memory_space<vmem>>, vector<1x2x8x128xf32>
      tpu.vector_store %arg4[%c0_23, %c0_24, %c0_25, %c0_26], %31 {strides = array<i32>} : memref<1x2x8x128xf32, #tpu.memory_space<vmem>>, vector<1x2x8x128xf32>,
    } else {
    }
    %cst = arith.constant 0.000000e+00 : f32
    %3 = vector.broadcast %cst : f32 to vector<8x128xf32>
    %c0 = arith.constant 0 : index
    %c0_1 = arith.constant 0 : index
    %4 = vector.load %arg2[%c0, %c0_1] : memref<16x128xf32, #tpu.memory_space<vmem>>, vector<16x128xf32>
    %c0_2 = arith.constant 0 : index
    %c0_3 = arith.constant 0 : index
    %5 = vector.load %arg3[%c0_2, %c0_3] : memref<16x128xf32, #tpu.memory_space<vmem>>, vector<16x128xf32>
    %6 = arith.negf %4 : vector<16x128xf32>
    %7 = math.exp %6 : vector<16x128xf32>
    %cst_4 = arith.constant 1.000000e+00 : f32
    %8 = vector.broadcast %cst_4 : f32 to vector<16x128xf32>
    %9 = arith.addf %8, %7 : vector<16x128xf32>
    %10 = arith.divf %8, %9 : vector<16x128xf32>
    %11 = arith.mulf %10, %5 : vector<16x128xf32>
    %12 = vector.shape_cast %11 : vector<16x128xf32> to vector<2x8x128xf32>
    %cst_5 = arith.constant dense<0.000000e+00> : vector<8x128xf32>
    %13 = vector.multi_reduction <add>, %12, %cst_5 [0] : vector<2x8x128xf32> to vector<8x128xf32>
    %14 = arith.addf %10, %5 : vector<16x128xf32>
    %15 = vector.shape_cast %14 : vector<16x128xf32> to vector<2x8x128xf32>
    %cst_6 = arith.constant dense<0.000000e+00> : vector<8x128xf32>
    %16 = vector.multi_reduction <add>, %15, %cst_6 [0] : vector<2x8x128xf32> to vector<8x128xf32>
    %17 = arith.addf %3, %13 : vector<8x128xf32>
    %18 = arith.addf %3, %16 : vector<8x128xf32>
    %c0_7 = arith.constant 0 : index
    %c0_8 = arith.constant 0 : index
    %c0_9 = arith.constant 0 : index
    %c0_10 = arith.constant 0 : index
    %19 = vector.load %arg4[%c0_7, %c0_8, %c0_9, %c0_10] : memref<1x2x8x128xf32, #tpu.memory_space<vmem>>, vector<1x1x8x128xf32>
    %20 = vector.shape_cast %19 : vector<1x1x8x128xf32> to vector<8x128xf32>
    %21 = arith.addf %20, %17 : vector<8x128xf32>
    %c0_11 = arith.constant 0 : index
    %c0_12 = arith.constant 0 : index
    %c0_13 = arith.constant 0 : index
    %c0_14 = arith.constant 0 : index
    %22 = vector.load %arg4[%c0_11, %c0_12, %c0_13, %c0_14] : memref<1x2x8x128xf32, #tpu.memory_space<vmem>>, vector<1x1x8x128xf32>
    %23 = vector.shape_cast %22 : vector<1x1x8x128xf32> to vector<8x128xf32>
    %24 = vector.shape_cast %21 : vector<8x128xf32> to vector<1x1x8x128xf32>
    tpu.vector_store %arg4[%c0_11, %c0_12, %c0_13, %c0_14], %24 {strides = array<i32>} : memref<1x2x8x128xf32, #tpu.memory_space<vmem>>, vector<1x1x8x128xf32>,
    %c0_15 = arith.constant 0 : index
    %c1 = arith.constant 1 : index
    %c0_16 = arith.constant 0 : index
    %c0_17 = arith.constant 0 : index
    %25 = vector.load %arg4[%c0_15, %c1, %c0_16, %c0_17] : memref<1x2x8x128xf32, #tpu.memory_space<vmem>>, vector<1x1x8x128xf32>
    %26 = vector.shape_cast %25 : vector<1x1x8x128xf32> to vector<8x128xf32>
    %27 = arith.addf %26, %18 : vector<8x128xf32>
    %c0_18 = arith.constant 0 : index
    %c1_19 = arith.constant 1 : index
    %c0_20 = arith.constant 0 : index
    %c0_21 = arith.constant 0 : index
    %28 = vector.load %arg4[%c0_18, %c1_19, %c0_20, %c0_21] : memref<1x2x8x128xf32, #tpu.memory_space<vmem>>, vector<1x1x8x128xf32>
    %29 = vector.shape_cast %28 : vector<1x1x8x128xf32> to vector<8x128xf32>
    %30 = vector.shape_cast %27 : vector<8x128xf32> to vector<1x1x8x128xf32>
    tpu.vector_store %arg4[%c0_18, %c1_19, %c0_20, %c0_21], %30 {strides = array<i32>} : memref<1x2x8x128xf32, #tpu.memory_space<vmem>>, vector<1x1x8x128xf32>,
    return
  }
  func.func @transform_0(%arg0: i32, %arg1: i32) -> (i32, i32) {
    %c1_i32 = arith.constant 1 : i32
    %0 = arith.muli %arg0, %c1_i32 : i32
    %1 = arith.addi %0, %arg1 : i32
    %c0_i32 = arith.constant 0 : i32
    %2 = arith.minsi %1, %c0_i32 : i32
    %c0_i32_0 = arith.constant 0 : i32
    %c0_i32_1 = arith.constant 0 : i32
    return %2, %c0_i32_0 : i32, i32
  }
  func.func @transform_1(%arg0: i32, %arg1: i32) -> (i32, i32) {
    %c1_i32 = arith.constant 1 : i32
    %0 = arith.muli %arg0, %c1_i32 : i32
    %1 = arith.addi %0, %arg1 : i32
    %c0_i32 = arith.constant 0 : i32
    %2 = arith.minsi %1, %c0_i32 : i32
    %c0_i32_0 = arith.constant 0 : i32
    %c0_i32_1 = arith.constant 0 : i32
    return %2, %c0_i32_0 : i32, i32
  }
  func.func @transform_2(%arg0: i32, %arg1: i32) -> (i32, i32, i32, i32) {
    %c0_i32 = arith.constant 0 : i32
    %c0_i32_0 = arith.constant 0 : i32
    %c0_i32_1 = arith.constant 0 : i32
    %c0_i32_2 = arith.constant 0 : i32
    return %arg0, %c0_i32, %c0_i32_0, %c0_i32_1 : i32, i32, i32, i32
  }
}

</mosaic_0001>

<bundles_post_ra>
// kernel: dice_loss.1
= control target key start
LH: loop header
LB: loop body
LE: loop exit
PB: predicated region body
PF: predicated region fallthrough
CT: control target
= control target key end

     0   :  { %s174_s0 = inlined_call_operand.vmem [shape: f32[16,128], index: 0, kind: input, shape index: {}]   ;;  %s175_s1 = inlined_call_operand.vmem [shape: f32[16,128], index: 1, kind: input, shape index: {}]   ;;  %s176_s2 = inlined_call_operand.vmem [shape: f32[1,2,8,128], index: 2, kind: output, shape index: {}]  }
   0x1   :  { %v81_v0 = vld [vmem:[%s174_s0] sm:$0xff]  ;;  %v82_v1 = vld [vmem:[%s174_s0 + $0x8] sm:$0xff] }
   0x2   :  { %v128_v2 = vmul.f32 -1.442695, %v81_v0  ;;  %v129_v3 = vmul.f32 -1.442695, %v82_v1  ;;  %v83_v8 = vld [vmem:[%s175_s1] sm:$0xff]  ;;  %v84_v9 = vld [vmem:[%s175_s1 + $0x8] sm:$0xff] }
   0x4   :  { %133 = vpow2.f32 %v128_v2 }
   0x5   :  { %135 = vpow2.f32 %v129_v3 }
   0xe   :  { %v134_v4 = vpop.eup %133 }
   0xf   :  { %v136_v5 = vpop.eup %135  ;;  %v91_v6 = vadd.f32 1.0, %v134_v4 }
  0x10   :  { %v92_v7 = vadd.f32 1.0, %v136_v5 }
  0x11   :  { %137 = vrcp.f32 %v91_v6 }
  0x12   :  { %139 = vrcp.f32 %v92_v7 }
  0x1b   :  { %v138_v10 = vpop.eup %137 }
  0x1c   :  { %v140_v11 = vpop.eup %139  ;;  %v97_v12 = vmul.f32 %v138_v10, %v83_v8  ;;  %v100_v13 = vadd.f32 %v138_v10, %v83_v8 }
  0x1d   :  { %v98_v14 = vmul.f32 %v140_v11, %v84_v9  ;;  %v101_v15 = vadd.f32 %v140_v11, %v84_v9 }
  0x1f   :  { %v99_v16 = vadd.f32 %v98_v14, %v97_v12  ;;  %v102_v17 = vadd.f32 %v101_v15, %v100_v13 }
  0x21   :  { %107 = vst [vmem:[%s176_s2] sm:$0xff] %v99_v16  ;;  %131 = vst [vmem:[%s176_s2 + $0x8] sm:$0xff] %v102_v17 }

</bundles_post_ra>
